<compile_context>
chip_gen: v5e
topology: v5e:2x2
jax: 0.10.0
libtpu: 0.0.40
codegen_flags: <defaults>
</compile_context>

<pallas_src>
import functools

import jax
import jax.numpy as jnp
from jax.experimental import pallas as pl
from jax.experimental.pallas import tpu as pltpu


# --------------------------------------------------------------------------- #
# Kernel
# --------------------------------------------------------------------------- #
def _encoder_pog_kernel(num_trans,
                        ctx_ref, w1_ref, b1_ref, w2_ref, b2_ref,
                        w3m_ref, b3m_ref, w3v_ref, b3v_ref, eps_ref,
                        z_ref, zmu_ref, zvar_ref):
    TB, L = eps_ref.shape
    N = num_trans

    # ---- MLP encoder on a (TB*N, C) bf16 slab: tall-M matmuls, f32 accum ----
    x = ctx_ref[...]                                                  # bf16
    h = jnp.dot(x, w1_ref[...], preferred_element_type=jnp.float32) + b1_ref[...]
    h = jnp.maximum(h, 0.0).astype(jnp.bfloat16)
    h = jnp.dot(h, w2_ref[...], preferred_element_type=jnp.float32) + b2_ref[...]
    h = jnp.maximum(h, 0.0).astype(jnp.bfloat16)

    # lane-aligned mu / variance heads (two (H, L) matmuls on resident weights)
    mu = jnp.dot(h, w3m_ref[...], preferred_element_type=jnp.float32) + b3m_ref[...]
    pre = jnp.dot(h, w3v_ref[...], preferred_element_type=jnp.float32) + b3v_ref[...]

    # ---- softplus + clamp(min=1e-7), f32 ----
    sigma_sq = jnp.maximum(jax.nn.softplus(pre), 1e-7)                # (TB*N, L)

    # large per-element reciprocal on the EUP (approximate path)
    rec = pl.reciprocal(sigma_sq, approx=True)                        # (TB*N, L)

    # ---- product of Gaussians over the transition axis (per task) ----
    rec = rec.reshape(TB, N, L)
    mu = mu.reshape(TB, N, L)
    z_var = pl.reciprocal(jnp.sum(rec, axis=1))                       # (TB, L) exact
    z_mu = z_var * jnp.sum(mu * rec, axis=1)                          # (TB, L)

    # ---- reparameterized sample z ~ N(z_mu, z_var) ----
    z = z_mu + jnp.sqrt(z_var) * eps_ref[...]                         # (TB, L)

    z_ref[...] = z
    zmu_ref[...] = z_mu
    zvar_ref[...] = z_var


# --------------------------------------------------------------------------- #
# Tiling / VMEM planning
# --------------------------------------------------------------------------- #
def _round_up(x, m):
    return ((x + m - 1) // m) * m


def _plan_tiling(T, N, C, H, L):
    """Return (T_pad, TB, num_steps, vmem_limit_bytes).

    TB is VMEM-budgeted, a multiple of 8 (or the full T when T < 16), and for
    T >= 16 at least two grid steps are produced (v7x megacore).
    """
    try:
        info = pltpu.get_tpu_info()
        vmem_cap = int(getattr(info, "vmem_capacity_bytes", 64 << 20))
    except Exception:
        vmem_cap = 64 << 20
    vmem_limit = int(min(vmem_cap * 3 // 4, 64 << 20))

    # single-buffered bf16 weights + f32 biases (resident across the grid)
    weight_bytes = 2 * (C * H + H * H + 2 * H * L) + 4 * (2 * H + 2 * L)
    # per-task per-step bytes: double-buffered bf16 context rows + f32 eps,
    # 3 double-buffered f32 (TB, L) output rows, ~2x f32 activation slabs.
    per_task = (2 * 2 * N * C) + (2 * 4 * L) + (3 * 2 * 4 * L) \
        + 2 * 4 * N * (H + 2 * L)
    budget = max(vmem_limit - weight_bytes - (4 << 20), per_task * 8)
    tb_max = max(8, (budget // per_task) // 8 * 8)

    if T < 16:
        # Too few tasks to split across two TensorCores without >2x padding
        # waste; full-extent blocks so no (8,128) issue.
        return T, T, 1, vmem_limit

    tb = int(min(tb_max, _round_up((T + 1) // 2, 8)))
    t_pad = _round_up(T, tb)
    return t_pad, tb, t_pad // tb, vmem_limit


# --------------------------------------------------------------------------- #
# Wrapper
# --------------------------------------------------------------------------- #
def prob_context_encoder_forward(context, params, eps):
    """Returns (task_z, z_means, z_vars) like forward(..., return_prob_params=True)."""
    T, N, C = context.shape
    H = params["w1"].shape[1]
    L = params["w3"].shape[1] // 2

    T_pad, TB, steps, vmem_limit = _plan_tiling(T, N, C, H, L)

    ctx = context
    noise = eps
    if T_pad != T:
        ctx = jnp.concatenate(
            [ctx, jnp.zeros((T_pad - T, N, C), ctx.dtype)], axis=0)
        noise = jnp.concatenate(
            [noise, jnp.zeros((T_pad - T, L), noise.dtype)], axis=0)

    # wrapper-side layout plumbing: flatten + bf16 cast feed the MXU directly
    ctx_flat = ctx.reshape(T_pad * N, C).astype(jnp.bfloat16)
    w1 = params["w1"].astype(jnp.bfloat16)
    w2 = params["w2"].astype(jnp.bfloat16)
    w3 = params["w3"].astype(jnp.bfloat16)
    w3_mu, w3_var = w3[:, :L], w3[:, L:]
    b1 = params["b1"].astype(jnp.float32)
    b2 = params["b2"].astype(jnp.float32)
    b3_mu = params["b3"][:, :L].astype(jnp.float32)
    b3_var = params["b3"][:, L:].astype(jnp.float32)
    noise = noise.astype(jnp.float32)

    def build(single_buffer_weights):
        def resident(shape):
            nd = len(shape)
            kw = {}
            if single_buffer_weights:
                kw["pipeline_mode"] = pl.Buffered(1)   # grid-invariant block
            return pl.BlockSpec(shape, lambda t, _nd=nd: (0,) * _nd, **kw)

        grid_spec = pltpu.PrefetchScalarGridSpec(
            num_scalar_prefetch=0,
            grid=(steps,),
            in_specs=[
                pl.BlockSpec((TB * N, C), lambda t: (t, 0)),   # context slab
                resident((C, H)), resident((1, H)),            # layer 1
                resident((H, H)), resident((1, H)),            # layer 2
                resident((H, L)), resident((1, L)),            # mu head
                resident((H, L)), resident((1, L)),            # var head
                pl.BlockSpec((TB, L), lambda t: (t, 0)),       # per-task noise
            ],
            out_specs=(
                pl.BlockSpec((TB, L), lambda t: (t, 0)),       # z
                pl.BlockSpec((TB, L), lambda t: (t, 0)),       # z_means
                pl.BlockSpec((TB, L), lambda t: (t, 0)),       # z_vars
            ),
        )
        return pl.pallas_call(
            functools.partial(_encoder_pog_kernel, N),
            out_shape=(
                jax.ShapeDtypeStruct((T_pad, L), jnp.float32),
                jax.ShapeDtypeStruct((T_pad, L), jnp.float32),
                jax.ShapeDtypeStruct((T_pad, L), jnp.float32),
            ),
            grid_spec=grid_spec,
            compiler_params=pltpu.CompilerParams(
                dimension_semantics=("parallel",),     # megacore-shardable grid
                vmem_limit_bytes=vmem_limit,
            ),
        )

    args = (ctx_flat, w1, b1, w2, b2, w3_mu, b3_mu, w3_var, b3_var, noise)
    try:
        outs = jax.block_until_ready(build(True)(*args))
    except Exception:
        # Fallback if this jax build rejects pl.Buffered(1) on input specs.
        outs = build(False)(*args)
    z, z_means, z_vars = outs

    if T_pad != T:
        z, z_means, z_vars = z[:T], z_means[:T], z_vars[:T]
    return z, z_means, z_vars


# --------------------------------------------------------------------------- #
# Reference + init
# --------------------------------------------------------------------------- #
def _reference_forward(context, params, eps):
    """Pure-JAX reference mirroring the module semantics (bf16 matmul path)."""
    T, N, C = context.shape
    L = params["w3"].shape[1] // 2
    x = context.reshape(T * N, C).astype(jnp.bfloat16)
    w1 = params["w1"].astype(jnp.bfloat16)
    w2 = params["w2"].astype(jnp.bfloat16)
    w3 = params["w3"].astype(jnp.bfloat16)
    h = jnp.maximum(
        jnp.dot(x, w1, preferred_element_type=jnp.float32) + params["b1"], 0.0)
    h = jnp.maximum(
        jnp.dot(h.astype(jnp.bfloat16), w2,
                preferred_element_type=jnp.float32) + params["b2"], 0.0)
    out = jnp.dot(h.astype(jnp.bfloat16), w3,
                  preferred_element_type=jnp.float32) + params["b3"]
    out = out.reshape(T, N, 2 * L)
    mu = out[..., :L]
    sig = jnp.clip(jax.nn.softplus(out[..., L:]), 1e-7, None)
    var = 1.0 / jnp.sum(1.0 / sig, axis=1)
    mean = var * jnp.sum(mu / sig, axis=1)
    z = mean + jnp.sqrt(var) * eps
    return z, mean, var


def _init_params(key, context_dim, hidden_dim, latent_dim):
    """Deterministic torch.nn.Linear-style init: U(-1/sqrt(fan_in), 1/sqrt(fan_in))."""
    ks = jax.random.split(key, 6)

    def lin(kw, kb, fan_in, fan_out):
        bound = 1.0 / jnp.sqrt(fan_in)
        w = jax.random.uniform(kw, (fan_in, fan_out), jnp.float32, -bound, bound)
        b = jax.random.uniform(kb, (1, fan_out), jnp.float32, -bound, bound)
        return w, b

    w1, b1 = lin(ks[0], ks[1], context_dim, hidden_dim)
    w2, b2 = lin(ks[2], ks[3], hidden_dim, hidden_dim)
    w3, b3 = lin(ks[4], ks[5], hidden_dim, 2 * latent_dim)
    return dict(w1=w1, b1=b1, w2=w2, b2=b2, w3=w3, b3=b3)


if __name__ == "__main__":
    T, N, C = 2, 8, 16          # num_tasks, num_transitions, context_dim
    H, L = 32, 8                # mlp hidden size, latent_dim

    key = jax.random.PRNGKey(0)
    k_ctx, k_eps, k_par = jax.random.split(key, 3)

    context = jax.random.normal(k_ctx, (T, N, C), jnp.float32)
    eps = jax.random.normal(k_eps, (T, L), jnp.float32)   # rsample noise
    params = _init_params(k_par, C, H, L)

    z, z_means, z_vars = prob_context_encoder_forward(context, params, eps)
    jax.block_until_ready((z, z_means, z_vars))

    z_r, m_r, v_r = _reference_forward(context, params, eps)
    assert jnp.allclose(z, z_r, rtol=1e-2, atol=1e-2), "z mismatch"
    assert jnp.allclose(z_means, m_r, rtol=1e-2, atol=1e-2), "z_means mismatch"
    assert jnp.allclose(z_vars, v_r, rtol=1e-2, atol=1e-2), "z_vars mismatch"

    print("KERNEL_OK")
</pallas_src>

<mosaic_0001>
module attributes {stable_mosaic.version = 11 : i64} {
  func.func @_encoder_pog_kernel(%arg0: i32, %arg1: memref<16x16xbf16, #tpu.memory_space<vmem>>, %arg2: memref<16x32xbf16, #tpu.memory_space<vmem>>, %arg3: memref<1x32xf32, #tpu.memory_space<vmem>>, %arg4: memref<32x32xbf16, #tpu.memory_space<vmem>>, %arg5: memref<1x32xf32, #tpu.memory_space<vmem>>, %arg6: memref<32x8xbf16, #tpu.memory_space<vmem>>, %arg7: memref<1x8xf32, #tpu.memory_space<vmem>>, %arg8: memref<32x8xbf16, #tpu.memory_space<vmem>>, %arg9: memref<1x8xf32, #tpu.memory_space<vmem>>, %arg10: memref<2x8xf32, #tpu.memory_space<vmem>>, %arg11: memref<2x8xf32, #tpu.memory_space<vmem>>, %arg12: memref<2x8xf32, #tpu.memory_space<vmem>>, %arg13: memref<2x8xf32, #tpu.memory_space<vmem>>) attributes {dimension_semantics = [#tpu.dimension_semantics<parallel>], iteration_bounds = array<i64: 1>, scalar_prefetch = 0 : i64, scratch_operands = 0 : i64, tpu.core_type = #tpu.core_type<tc>, window_params = [{transform_indices = @transform_0, window_bounds = array<i64: 16, 16>}, {pipeline_mode = #tpu.pipeline_mode<synchronous>, transform_indices = @transform_1, window_bounds = array<i64: 16, 32>}, {pipeline_mode = #tpu.pipeline_mode<synchronous>, transform_indices = @transform_2, window_bounds = array<i64: 1, 32>}, {pipeline_mode = #tpu.pipeline_mode<synchronous>, transform_indices = @transform_3, window_bounds = array<i64: 32, 32>}, {pipeline_mode = #tpu.pipeline_mode<synchronous>, transform_indices = @transform_4, window_bounds = array<i64: 1, 32>}, {pipeline_mode = #tpu.pipeline_mode<synchronous>, transform_indices = @transform_5, window_bounds = array<i64: 32, 8>}, {pipeline_mode = #tpu.pipeline_mode<synchronous>, transform_indices = @transform_6, window_bounds = array<i64: 1, 8>}, {pipeline_mode = #tpu.pipeline_mode<synchronous>, transform_indices = @transform_7, window_bounds = array<i64: 32, 8>}, {pipeline_mode = #tpu.pipeline_mode<synchronous>, transform_indices = @transform_8, window_bounds = array<i64: 1, 8>}, {transform_indices = @transform_9, window_bounds = array<i64: 2, 8>}, {transform_indices = @transform_10, window_bounds = array<i64: 2, 8>}, {transform_indices = @transform_11, window_bounds = array<i64: 2, 8>}, {transform_indices = @transform_12, window_bounds = array<i64: 2, 8>}]} {
    %c0 = arith.constant 0 : index
    %c0_0 = arith.constant 0 : index
    %0 = vector.load %arg1[%c0, %c0_0] : memref<16x16xbf16, #tpu.memory_space<vmem>>, vector<16x16xbf16>
    %c0_1 = arith.constant 0 : index
    %c0_2 = arith.constant 0 : index
    %1 = vector.load %arg2[%c0_1, %c0_2] : memref<16x32xbf16, #tpu.memory_space<vmem>>, vector<16x32xbf16>
    %cst = arith.constant dense<0.000000e+00> : vector<16x32xf32>
    %2 = tpu.matmul %0, %1, %cst {dimension_numbers = #tpu.dot_dimension_numbers<[1], [0], [0], [1], [0, 0, 1, 1], [], []>} : vector<16x16xbf16>, vector<16x32xbf16>, vector<16x32xf32> -> vector<16x32xf32>
    %c0_3 = arith.constant 0 : index
    %c0_4 = arith.constant 0 : index
    %3 = vector.load %arg3[%c0_3, %c0_4] : memref<1x32xf32, #tpu.memory_space<vmem>>, vector<1x32xf32>
    %4 = vector.broadcast %3 : vector<1x32xf32> to vector<16x32xf32>
    %5 = arith.addf %2, %4 : vector<16x32xf32>
    %cst_5 = arith.constant 0.000000e+00 : f32
    %6 = vector.broadcast %cst_5 : f32 to vector<16x32xf32>
    %7 = arith.maximumf %5, %6 : vector<16x32xf32>
    %8 = arith.truncf %7 : vector<16x32xf32> to vector<16x32xbf16>
    %c0_6 = arith.constant 0 : index
    %c0_7 = arith.constant 0 : index
    %9 = vector.load %arg4[%c0_6, %c0_7] : memref<32x32xbf16, #tpu.memory_space<vmem>>, vector<32x32xbf16>
    %cst_8 = arith.constant dense<0.000000e+00> : vector<16x32xf32>
    %10 = tpu.matmul %8, %9, %cst_8 {dimension_numbers = #tpu.dot_dimension_numbers<[1], [0], [0], [1], [0, 0, 1, 1], [], []>} : vector<16x32xbf16>, vector<32x32xbf16>, vector<16x32xf32> -> vector<16x32xf32>
    %c0_9 = arith.constant 0 : index
    %c0_10 = arith.constant 0 : index
    %11 = vector.load %arg5[%c0_9, %c0_10] : memref<1x32xf32, #tpu.memory_space<vmem>>, vector<1x32xf32>
    %12 = vector.broadcast %11 : vector<1x32xf32> to vector<16x32xf32>
    %13 = arith.addf %10, %12 : vector<16x32xf32>
    %cst_11 = arith.constant 0.000000e+00 : f32
    %14 = vector.broadcast %cst_11 : f32 to vector<16x32xf32>
    %15 = arith.maximumf %13, %14 : vector<16x32xf32>
    %16 = arith.truncf %15 : vector<16x32xf32> to vector<16x32xbf16>
    %c0_12 = arith.constant 0 : index
    %c0_13 = arith.constant 0 : index
    %17 = vector.load %arg6[%c0_12, %c0_13] : memref<32x8xbf16, #tpu.memory_space<vmem>>, vector<32x8xbf16>
    %cst_14 = arith.constant dense<0.000000e+00> : vector<16x8xf32>
    %18 = tpu.matmul %16, %17, %cst_14 {dimension_numbers = #tpu.dot_dimension_numbers<[1], [0], [0], [1], [0, 0, 1, 1], [], []>} : vector<16x32xbf16>, vector<32x8xbf16>, vector<16x8xf32> -> vector<16x8xf32>
    %c0_15 = arith.constant 0 : index
    %c0_16 = arith.constant 0 : index
    %19 = vector.load %arg7[%c0_15, %c0_16] : memref<1x8xf32, #tpu.memory_space<vmem>>, vector<1x8xf32>
    %20 = vector.broadcast %19 : vector<1x8xf32> to vector<16x8xf32>
    %21 = arith.addf %18, %20 : vector<16x8xf32>
    %c0_17 = arith.constant 0 : index
    %c0_18 = arith.constant 0 : index
    %22 = vector.load %arg8[%c0_17, %c0_18] : memref<32x8xbf16, #tpu.memory_space<vmem>>, vector<32x8xbf16>
    %cst_19 = arith.constant dense<0.000000e+00> : vector<16x8xf32>
    %23 = tpu.matmul %16, %22, %cst_19 {dimension_numbers = #tpu.dot_dimension_numbers<[1], [0], [0], [1], [0, 0, 1, 1], [], []>} : vector<16x32xbf16>, vector<32x8xbf16>, vector<16x8xf32> -> vector<16x8xf32>
    %c0_20 = arith.constant 0 : index
    %c0_21 = arith.constant 0 : index
    %24 = vector.load %arg9[%c0_20, %c0_21] : memref<1x8xf32, #tpu.memory_space<vmem>>, vector<1x8xf32>
    %25 = vector.broadcast %24 : vector<1x8xf32> to vector<16x8xf32>
    %26 = arith.addf %23, %25 : vector<16x8xf32>
    %cst_22 = arith.constant 0.000000e+00 : f32
    %27 = vector.broadcast %cst_22 : f32 to vector<16x8xf32>
    %28 = arith.maximumf %26, %27 : vector<16x8xf32>
    %29 = vector.broadcast %cst_22 : f32 to vector<16x8xf32>
    %30 = arith.subf %26, %29 : vector<16x8xf32>
    %31 = arith.cmpf one, %30, %30 : vector<16x8xf32>
    %32 = vector.broadcast %cst_22 : f32 to vector<16x8xf32>
    %33 = arith.addf %26, %32 : vector<16x8xf32>
    %34 = math.absf %30 : vector<16x8xf32>
    %cst_23 = arith.constant 0.000000e+00 : f32
    %35 = vector.broadcast %cst_23 : f32 to vector<16x8xf32>
    %36 = arith.subf %35, %34 : vector<16x8xf32>
    %37 = math.exp %36 : vector<16x8xf32>
    %38 = math.log1p %37 : vector<16x8xf32>
    %39 = arith.addf %28, %38 : vector<16x8xf32>
    %40 = arith.select %31, %33, %39 : vector<16x8xi1>, vector<16x8xf32>
    %cst_24 = arith.constant 1.000000e-07 : f32
    %41 = vector.broadcast %cst_24 : f32 to vector<16x8xf32>
    %42 = arith.maximumf %40, %41 : vector<16x8xf32>
    %43 = tpu.reciprocal %42 {approx = true} : vector<16x8xf32> -> vector<16x8xf32>
    %44 = vector.shape_cast %43 : vector<16x8xf32> to vector<2x8x8xf32>
    %45 = vector.shape_cast %21 : vector<16x8xf32> to vector<2x8x8xf32>
    %cst_25 = arith.constant dense<0.000000e+00> : vector<2x8xf32>
    %46 = vector.multi_reduction <add>, %44, %cst_25 [1] : vector<2x8x8xf32> to vector<2x8xf32>
    %47 = tpu.reciprocal %46 : vector<2x8xf32> -> vector<2x8xf32>
    %48 = arith.mulf %45, %44 : vector<2x8x8xf32>
    %cst_26 = arith.constant dense<0.000000e+00> : vector<2x8xf32>
    %49 = vector.multi_reduction <add>, %48, %cst_26 [1] : vector<2x8x8xf32> to vector<2x8xf32>
    %50 = arith.mulf %47, %49 : vector<2x8xf32>
    %51 = math.sqrt %47 : vector<2x8xf32>
    %c0_27 = arith.constant 0 : index
    %c0_28 = arith.constant 0 : index
    %52 = vector.load %arg10[%c0_27, %c0_28] : memref<2x8xf32, #tpu.memory_space<vmem>>, vector<2x8xf32>
    %53 = arith.mulf %51, %52 : vector<2x8xf32>
    %54 = arith.addf %50, %53 : vector<2x8xf32>
    %c0_29 = arith.constant 0 : index
    %c0_30 = arith.constant 0 : index
    %55 = vector.load %arg11[%c0_29, %c0_30] : memref<2x8xf32, #tpu.memory_space<vmem>>, vector<2x8xf32>
    tpu.vector_store %arg11[%c0_29, %c0_30], %54 {strides = array<i32>} : memref<2x8xf32, #tpu.memory_space<vmem>>, vector<2x8xf32>,
    %c0_31 = arith.constant 0 : index
    %c0_32 = arith.constant 0 : index
    %56 = vector.load %arg12[%c0_31, %c0_32] : memref<2x8xf32, #tpu.memory_space<vmem>>, vector<2x8xf32>
    tpu.vector_store %arg12[%c0_31, %c0_32], %50 {strides = array<i32>} : memref<2x8xf32, #tpu.memory_space<vmem>>, vector<2x8xf32>,
    %c0_33 = arith.constant 0 : index
    %c0_34 = arith.constant 0 : index
    %57 = vector.load %arg13[%c0_33, %c0_34] : memref<2x8xf32, #tpu.memory_space<vmem>>, vector<2x8xf32>
    tpu.vector_store %arg13[%c0_33, %c0_34], %47 {strides = array<i32>} : memref<2x8xf32, #tpu.memory_space<vmem>>, vector<2x8xf32>,
    return
  }
  func.func @transform_0(%arg0: i32) -> (i32, i32) {
    %c0_i32 = arith.constant 0 : i32
    %c0_i32_0 = arith.constant 0 : i32
    return %arg0, %c0_i32 : i32, i32
  }
  func.func @transform_1(%arg0: i32) -> (i32, i32) {
    %c0_i32 = arith.constant 0 : i32
    %c0_i32_0 = arith.constant 0 : i32
    %c0_i32_1 = arith.constant 0 : i32
    return %c0_i32, %c0_i32_0 : i32, i32
  }
  func.func @transform_2(%arg0: i32) -> (i32, i32) {
    %c0_i32 = arith.constant 0 : i32
    %c0_i32_0 = arith.constant 0 : i32
    %c0_i32_1 = arith.constant 0 : i32
    return %c0_i32, %c0_i32_0 : i32, i32
  }
  func.func @transform_3(%arg0: i32) -> (i32, i32) {
    %c0_i32 = arith.constant 0 : i32
    %c0_i32_0 = arith.constant 0 : i32
    %c0_i32_1 = arith.constant 0 : i32
    return %c0_i32, %c0_i32_0 : i32, i32
  }
  func.func @transform_4(%arg0: i32) -> (i32, i32) {
    %c0_i32 = arith.constant 0 : i32
    %c0_i32_0 = arith.constant 0 : i32
    %c0_i32_1 = arith.constant 0 : i32
    return %c0_i32, %c0_i32_0 : i32, i32
  }
  func.func @transform_5(%arg0: i32) -> (i32, i32) {
    %c0_i32 = arith.constant 0 : i32
    %c0_i32_0 = arith.constant 0 : i32
    %c0_i32_1 = arith.constant 0 : i32
    return %c0_i32, %c0_i32_0 : i32, i32
  }
  func.func @transform_6(%arg0: i32) -> (i32, i32) {
    %c0_i32 = arith.constant 0 : i32
    %c0_i32_0 = arith.constant 0 : i32
    %c0_i32_1 = arith.constant 0 : i32
    return %c0_i32, %c0_i32_0 : i32, i32
  }
  func.func @transform_7(%arg0: i32) -> (i32, i32) {
    %c0_i32 = arith.constant 0 : i32
    %c0_i32_0 = arith.constant 0 : i32
    %c0_i32_1 = arith.constant 0 : i32
    return %c0_i32, %c0_i32_0 : i32, i32
  }
  func.func @transform_8(%arg0: i32) -> (i32, i32) {
    %c0_i32 = arith.constant 0 : i32
    %c0_i32_0 = arith.constant 0 : i32
    %c0_i32_1 = arith.constant 0 : i32
    return %c0_i32, %c0_i32_0 : i32, i32
  }
  func.func @transform_9(%arg0: i32) -> (i32, i32) {
    %c0_i32 = arith.constant 0 : i32
    %c0_i32_0 = arith.constant 0 : i32
    return %arg0, %c0_i32 : i32, i32
  }
  func.func @transform_10(%arg0: i32) -> (i32, i32) {
    %c0_i32 = arith.constant 0 : i32
    %c0_i32_0 = arith.constant 0 : i32
    return %arg0, %c0_i32 : i32, i32
  }
  func.func @transform_11(%arg0: i32) -> (i32, i32) {
    %c0_i32 = arith.constant 0 : i32
    %c0_i32_0 = arith.constant 0 : i32
    return %arg0, %c0_i32 : i32, i32
  }
  func.func @transform_12(%arg0: i32) -> (i32, i32) {
    %c0_i32 = arith.constant 0 : i32
    %c0_i32_0 = arith.constant 0 : i32
    return %arg0, %c0_i32 : i32, i32
  }
}

module attributes {stable_mosaic.version = 11 : i64} {
  func.func @_encoder_pog_kernel(%arg0: i32, %arg1: memref<16x16xbf16, #tpu.memory_space<vmem>>, %arg2: memref<16x32xbf16, #tpu.memory_space<vmem>>, %arg3: memref<1x32xf32, #tpu.memory_space<vmem>>, %arg4: memref<32x32xbf16, #tpu.memory_space<vmem>>, %arg5: memref<1x32xf32, #tpu.memory_space<vmem>>, %arg6: memref<32x8xbf16, #tpu.memory_space<vmem>>, %arg7: memref<1x8xf32, #tpu.memory_space<vmem>>, %arg8: memref<32x8xbf16, #tpu.memory_space<vmem>>, %arg9: memref<1x8xf32, #tpu.memory_space<vmem>>, %arg10: memref<2x8xf32, #tpu.memory_space<vmem>>, %arg11: memref<2x8xf32, #tpu.memory_space<vmem>>, %arg12: memref<2x8xf32, #tpu.memory_space<vmem>>, %arg13: memref<2x8xf32, #tpu.memory_space<vmem>>) attributes {dimension_semantics = [#tpu.dimension_semantics<parallel>], iteration_bounds = array<i64: 1>, scalar_prefetch = 0 : i64, scratch_operands = 0 : i64, tpu.core_type = #tpu.core_type<tc>, window_params = [{transform_indices = @transform_0, window_bounds = array<i64: 16, 16>}, {pipeline_mode = #tpu.pipeline_mode<synchronous>, transform_indices = @transform_1, window_bounds = array<i64: 16, 32>}, {pipeline_mode = #tpu.pipeline_mode<synchronous>, transform_indices = @transform_2, window_bounds = array<i64: 1, 32>}, {pipeline_mode = #tpu.pipeline_mode<synchronous>, transform_indices = @transform_3, window_bounds = array<i64: 32, 32>}, {pipeline_mode = #tpu.pipeline_mode<synchronous>, transform_indices = @transform_4, window_bounds = array<i64: 1, 32>}, {pipeline_mode = #tpu.pipeline_mode<synchronous>, transform_indices = @transform_5, window_bounds = array<i64: 32, 8>}, {pipeline_mode = #tpu.pipeline_mode<synchronous>, transform_indices = @transform_6, window_bounds = array<i64: 1, 8>}, {pipeline_mode = #tpu.pipeline_mode<synchronous>, transform_indices = @transform_7, window_bounds = array<i64: 32, 8>}, {pipeline_mode = #tpu.pipeline_mode<synchronous>, transform_indices = @transform_8, window_bounds = array<i64: 1, 8>}, {transform_indices = @transform_9, window_bounds = array<i64: 2, 8>}, {transform_indices = @transform_10, window_bounds = array<i64: 2, 8>}, {transform_indices = @transform_11, window_bounds = array<i64: 2, 8>}, {transform_indices = @transform_12, window_bounds = array<i64: 2, 8>}]} {
    %c0 = arith.constant 0 : index
    %c0_0 = arith.constant 0 : index
    %0 = vector.load %arg1[%c0, %c0_0] : memref<16x16xbf16, #tpu.memory_space<vmem>>, vector<16x16xbf16>
    %c0_1 = arith.constant 0 : index
    %c0_2 = arith.constant 0 : index
    %1 = vector.load %arg2[%c0_1, %c0_2] : memref<16x32xbf16, #tpu.memory_space<vmem>>, vector<16x32xbf16>
    %cst = arith.constant dense<0.000000e+00> : vector<16x32xf32>
    %2 = tpu.matmul %0, %1, %cst {dimension_numbers = #tpu.dot_dimension_numbers<[1], [0], [0], [1], [0, 0, 1, 1], [], []>} : vector<16x16xbf16>, vector<16x32xbf16>, vector<16x32xf32> -> vector<16x32xf32>
    %c0_3 = arith.constant 0 : index
    %c0_4 = arith.constant 0 : index
    %3 = vector.load %arg3[%c0_3, %c0_4] : memref<1x32xf32, #tpu.memory_space<vmem>>, vector<1x32xf32>
    %4 = vector.broadcast %3 : vector<1x32xf32> to vector<16x32xf32>
    %5 = arith.addf %2, %4 : vector<16x32xf32>
    %cst_5 = arith.constant 0.000000e+00 : f32
    %6 = vector.broadcast %cst_5 : f32 to vector<16x32xf32>
    %7 = arith.maximumf %5, %6 : vector<16x32xf32>
    %8 = arith.truncf %7 : vector<16x32xf32> to vector<16x32xbf16>
    %c0_6 = arith.constant 0 : index
    %c0_7 = arith.constant 0 : index
    %9 = vector.load %arg4[%c0_6, %c0_7] : memref<32x32xbf16, #tpu.memory_space<vmem>>, vector<32x32xbf16>
    %cst_8 = arith.constant dense<0.000000e+00> : vector<16x32xf32>
    %10 = tpu.matmul %8, %9, %cst_8 {dimension_numbers = #tpu.dot_dimension_numbers<[1], [0], [0], [1], [0, 0, 1, 1], [], []>} : vector<16x32xbf16>, vector<32x32xbf16>, vector<16x32xf32> -> vector<16x32xf32>
    %c0_9 = arith.constant 0 : index
    %c0_10 = arith.constant 0 : index
    %11 = vector.load %arg5[%c0_9, %c0_10] : memref<1x32xf32, #tpu.memory_space<vmem>>, vector<1x32xf32>
    %12 = vector.broadcast %11 : vector<1x32xf32> to vector<16x32xf32>
    %13 = arith.addf %10, %12 : vector<16x32xf32>
    %cst_11 = arith.constant 0.000000e+00 : f32
    %14 = vector.broadcast %cst_11 : f32 to vector<16x32xf32>
    %15 = arith.maximumf %13, %14 : vector<16x32xf32>
    %16 = arith.truncf %15 : vector<16x32xf32> to vector<16x32xbf16>
    %c0_12 = arith.constant 0 : index
    %c0_13 = arith.constant 0 : index
    %17 = vector.load %arg6[%c0_12, %c0_13] : memref<32x8xbf16, #tpu.memory_space<vmem>>, vector<32x8xbf16>
    %cst_14 = arith.constant dense<0.000000e+00> : vector<16x8xf32>
    %18 = tpu.matmul %16, %17, %cst_14 {dimension_numbers = #tpu.dot_dimension_numbers<[1], [0], [0], [1], [0, 0, 1, 1], [], []>} : vector<16x32xbf16>, vector<32x8xbf16>, vector<16x8xf32> -> vector<16x8xf32>
    %c0_15 = arith.constant 0 : index
    %c0_16 = arith.constant 0 : index
    %19 = vector.load %arg7[%c0_15, %c0_16] : memref<1x8xf32, #tpu.memory_space<vmem>>, vector<1x8xf32>
    %20 = vector.broadcast %19 : vector<1x8xf32> to vector<16x8xf32>
    %21 = arith.addf %18, %20 : vector<16x8xf32>
    %c0_17 = arith.constant 0 : index
    %c0_18 = arith.constant 0 : index
    %22 = vector.load %arg8[%c0_17, %c0_18] : memref<32x8xbf16, #tpu.memory_space<vmem>>, vector<32x8xbf16>
    %cst_19 = arith.constant dense<0.000000e+00> : vector<16x8xf32>
    %23 = tpu.matmul %16, %22, %cst_19 {dimension_numbers = #tpu.dot_dimension_numbers<[1], [0], [0], [1], [0, 0, 1, 1], [], []>} : vector<16x32xbf16>, vector<32x8xbf16>, vector<16x8xf32> -> vector<16x8xf32>
    %c0_20 = arith.constant 0 : index
    %c0_21 = arith.constant 0 : index
    %24 = vector.load %arg9[%c0_20, %c0_21] : memref<1x8xf32, #tpu.memory_space<vmem>>, vector<1x8xf32>
    %25 = vector.broadcast %24 : vector<1x8xf32> to vector<16x8xf32>
    %26 = arith.addf %23, %25 : vector<16x8xf32>
    %cst_22 = arith.constant 0.000000e+00 : f32
    %27 = vector.broadcast %cst_22 : f32 to vector<16x8xf32>
    %28 = arith.maximumf %26, %27 : vector<16x8xf32>
    %29 = vector.broadcast %cst_22 : f32 to vector<16x8xf32>
    %30 = arith.subf %26, %29 : vector<16x8xf32>
    %31 = arith.cmpf one, %30, %30 : vector<16x8xf32>
    %32 = vector.broadcast %cst_22 : f32 to vector<16x8xf32>
    %33 = arith.addf %26, %32 : vector<16x8xf32>
    %34 = math.absf %30 : vector<16x8xf32>
    %cst_23 = arith.constant 0.000000e+00 : f32
    %35 = vector.broadcast %cst_23 : f32 to vector<16x8xf32>
    %36 = arith.subf %35, %34 : vector<16x8xf32>
    %37 = math.exp %36 : vector<16x8xf32>
    %38 = math.log1p %37 : vector<16x8xf32>
    %39 = arith.addf %28, %38 : vector<16x8xf32>
    %40 = arith.select %31, %33, %39 : vector<16x8xi1>, vector<16x8xf32>
    %cst_24 = arith.constant 1.000000e-07 : f32
    %41 = vector.broadcast %cst_24 : f32 to vector<16x8xf32>
    %42 = arith.maximumf %40, %41 : vector<16x8xf32>
    %43 = tpu.reciprocal %42 {approx = true} : vector<16x8xf32> -> vector<16x8xf32>
    %44 = vector.shape_cast %43 : vector<16x8xf32> to vector<2x8x8xf32>
    %45 = vector.shape_cast %21 : vector<16x8xf32> to vector<2x8x8xf32>
    %cst_25 = arith.constant dense<0.000000e+00> : vector<2x8xf32>
    %46 = vector.multi_reduction <add>, %44, %cst_25 [1] : vector<2x8x8xf32> to vector<2x8xf32>
    %47 = tpu.reciprocal %46 : vector<2x8xf32> -> vector<2x8xf32>
    %48 = arith.mulf %45, %44 : vector<2x8x8xf32>
    %cst_26 = arith.constant dense<0.000000e+00> : vector<2x8xf32>
    %49 = vector.multi_reduction <add>, %48, %cst_26 [1] : vector<2x8x8xf32> to vector<2x8xf32>
    %50 = arith.mulf %47, %49 : vector<2x8xf32>
    %51 = math.sqrt %47 : vector<2x8xf32>
    %c0_27 = arith.constant 0 : index
    %c0_28 = arith.constant 0 : index
    %52 = vector.load %arg10[%c0_27, %c0_28] : memref<2x8xf32, #tpu.memory_space<vmem>>, vector<2x8xf32>
    %53 = arith.mulf %51, %52 : vector<2x8xf32>
    %54 = arith.addf %50, %53 : vector<2x8xf32>
    %c0_29 = arith.constant 0 : index
    %c0_30 = arith.constant 0 : index
    %55 = vector.load %arg11[%c0_29, %c0_30] : memref<2x8xf32, #tpu.memory_space<vmem>>, vector<2x8xf32>
    tpu.vector_store %arg11[%c0_29, %c0_30], %54 {strides = array<i32>} : memref<2x8xf32, #tpu.memory_space<vmem>>, vector<2x8xf32>,
    %c0_31 = arith.constant 0 : index
    %c0_32 = arith.constant 0 : index
    %56 = vector.load %arg12[%c0_31, %c0_32] : memref<2x8xf32, #tpu.memory_space<vmem>>, vector<2x8xf32>
    tpu.vector_store %arg12[%c0_31, %c0_32], %50 {strides = array<i32>} : memref<2x8xf32, #tpu.memory_space<vmem>>, vector<2x8xf32>,
    %c0_33 = arith.constant 0 : index
    %c0_34 = arith.constant 0 : index
    %57 = vector.load %arg13[%c0_33, %c0_34] : memref<2x8xf32, #tpu.memory_space<vmem>>, vector<2x8xf32>
    tpu.vector_store %arg13[%c0_33, %c0_34], %47 {strides = array<i32>} : memref<2x8xf32, #tpu.memory_space<vmem>>, vector<2x8xf32>,
    return
  }
  func.func @transform_0(%arg0: i32) -> (i32, i32) {
    %c0_i32 = arith.constant 0 : i32
    %c0_i32_0 = arith.constant 0 : i32
    return %arg0, %c0_i32 : i32, i32
  }
  func.func @transform_1(%arg0: i32) -> (i32, i32) {
    %c0_i32 = arith.constant 0 : i32
    %c0_i32_0 = arith.constant 0 : i32
    %c0_i32_1 = arith.constant 0 : i32
    return %c0_i32, %c0_i32_0 : i32, i32
  }
  func.func @transform_2(%arg0: i32) -> (i32, i32) {
    %c0_i32 = arith.constant 0 : i32
    %c0_i32_0 = arith.constant 0 : i32
    %c0_i32_1 = arith.constant 0 : i32
    return %c0_i32, %c0_i32_0 : i32, i32
  }
  func.func @transform_3(%arg0: i32) -> (i32, i32) {
    %c0_i32 = arith.constant 0 : i32
    %c0_i32_0 = arith.constant 0 : i32
    %c0_i32_1 = arith.constant 0 : i32
    return %c0_i32, %c0_i32_0 : i32, i32
  }
  func.func @transform_4(%arg0: i32) -> (i32, i32) {
    %c0_i32 = arith.constant 0 : i32
    %c0_i32_0 = arith.constant 0 : i32
    %c0_i32_1 = arith.constant 0 : i32
    return %c0_i32, %c0_i32_0 : i32, i32
  }
  func.func @transform_5(%arg0: i32) -> (i32, i32) {
    %c0_i32 = arith.constant 0 : i32
    %c0_i32_0 = arith.constant 0 : i32
    %c0_i32_1 = arith.constant 0 : i32
    return %c0_i32, %c0_i32_0 : i32, i32
  }
  func.func @transform_6(%arg0: i32) -> (i32, i32) {
    %c0_i32 = arith.constant 0 : i32
    %c0_i32_0 = arith.constant 0 : i32
    %c0_i32_1 = arith.constant 0 : i32
    return %c0_i32, %c0_i32_0 : i32, i32
  }
  func.func @transform_7(%arg0: i32) -> (i32, i32) {
    %c0_i32 = arith.constant 0 : i32
    %c0_i32_0 = arith.constant 0 : i32
    %c0_i32_1 = arith.constant 0 : i32
    return %c0_i32, %c0_i32_0 : i32, i32
  }
  func.func @transform_8(%arg0: i32) -> (i32, i32) {
    %c0_i32 = arith.constant 0 : i32
    %c0_i32_0 = arith.constant 0 : i32
    %c0_i32_1 = arith.constant 0 : i32
    return %c0_i32, %c0_i32_0 : i32, i32
  }
  func.func @transform_9(%arg0: i32) -> (i32, i32) {
    %c0_i32 = arith.constant 0 : i32
    %c0_i32_0 = arith.constant 0 : i32
    return %arg0, %c0_i32 : i32, i32
  }
  func.func @transform_10(%arg0: i32) -> (i32, i32) {
    %c0_i32 = arith.constant 0 : i32
    %c0_i32_0 = arith.constant 0 : i32
    return %arg0, %c0_i32 : i32, i32
  }
  func.func @transform_11(%arg0: i32) -> (i32, i32) {
    %c0_i32 = arith.constant 0 : i32
    %c0_i32_0 = arith.constant 0 : i32
    return %arg0, %c0_i32 : i32, i32
  }
  func.func @transform_12(%arg0: i32) -> (i32, i32) {
    %c0_i32 = arith.constant 0 : i32
    %c0_i32_0 = arith.constant 0 : i32
    return %arg0, %c0_i32 : i32, i32
  }
}

</mosaic_0001>

<bundles_post_ra>
// kernel: tpu_custom_call.1
= control target key start
LH: loop header
LB: loop body
LE: loop exit
PB: predicated region body
PF: predicated region fallthrough
CT: control target
= control target key end

     0   :  { %18 = vsyncpa [#allocation3], 0  ;;  %vm60_vm0 = vcmask 130048   ;;  %s668_s0 = inlined_call_operand.vmem [shape: bf16[16,16], index: 0, kind: input, shape index: {}]   ;;  %s669_s1 = inlined_call_operand.vmem [shape: bf16[16,32], index: 1, kind: input, shape index: {}]   ;;  %s670_s2 = inlined_call_operand.vmem [shape: f32[1,32], index: 2, kind: input, shape index: {}]   ;;  %s671_s3 = inlined_call_operand.vmem [shape: bf16[32,32], index: 3, kind: input, shape index: {}]   ;;  %s672_s4 = inlined_call_operand.vmem [shape: f32[1,32], index: 4, kind: input, shape index: {}]   ;;  %s673_s5 = inlined_call_operand.vmem [shape: bf16[32,8], index: 5, kind: input, shape index: {}]   ;;  %s674_s6 = inlined_call_operand.vmem [shape: f32[1,8], index: 6, kind: input, shape index: {}]   ;;  %s675_s7 = inlined_call_operand.vmem [shape: bf16[32,8], index: 7, kind: input, shape index: {}]   ;;  %s676_s8 = inlined_call_operand.vmem [shape: f32[1,8], index: 8, kind: input, shape index: {}]   ;;  %s677_s9 = inlined_call_operand.vmem [shape: f32[2,8], index: 9, kind: input, shape index: {}]   ;;  %s678_s10 = inlined_call_operand.hbm [shape: f32[2,8], index: 10, kind: output, shape index: {0}]   ;;  %s679_s11 = inlined_call_operand.hbm [shape: f32[2,8], index: 11, kind: output, shape index: {1}]   ;;  %s680_s12 = inlined_call_operand.hbm [shape: f32[2,8], index: 12, kind: output, shape index: {2}]  }
   0x1   :  { %v429_v0 = vld [vmem:[%s669_s1] sm:$0xff] }
   0x2   :  { %v428_v1 = vld [vmem:[%s668_s0] sm:$0xff]  ;;  %71 = vmatpush.bf16.msra.mxu0 %v429_v0 }
   0x3   :  { %19 = vsyncpa [#allocation5], 0  ;;  %v431_v2 = vld [vmem:[%s671_s3 + $0x8] sm:$0xff]  ;;  %v430_v3 = vld [vmem:[%s671_s3] sm:$0xff]  ;;  %vm101_vm1 = vcmask 261120   ;;  %vm233_vm5 = vcmask 64512  }
   0x4   :  { %111 = vmatpush.bf16.msra.mxu1 %v431_v2  ;;  %v439_v5 = vld [vmem:[%s670_s2] ss:$0 sm:$0xff]  ;;  %v433_v12 = vld [vmem:[%s673_s5 + $0x8] sm:$0xff]  ;;  %vm330_vm14 = vcmask 1041409   ;;  %s363_s22 = sshll.u32 %s679_s11, 4  ;;  %s540_s23 = smov [#allocation6]   ;;  %s364_s22 = int_to_ptr.hbm [resolvable:$true] %s363_s22 }
   0x5   :  { %400 = vmatmul.msk.bf16.vlgmr.msra.gmra.mxu0 %vm60_vm0, %v428_v1  ;;  %v435_v13 = vld [vmem:[%s675_s7 + $0x8] sm:$0xff]  ;;  %151 = vmatpush.bf16.msra.mxu2 %v433_v12  ;;  %v432_v14 = vld [vmem:[%s673_s5] sm:$0xff]  ;;  %vm333_vm0 = vcmask 58368   ;;  %s372_s24 = sshll.u32 %s540_s23, 4  ;;  %s374_s27 = sshll.u32 %s680_s12, 4  ;;  %s373_s24 = int_to_ptr.vmem [resolvable:$true] %s372_s24  ;;  %s375_s27 = int_to_ptr.hbm [resolvable:$true] %s374_s27 }
   0x6   :  { %185 = vmatpush.bf16.msra.mxu3 %v435_v13  ;;  %v434_v15 = vld [vmem:[%s675_s7] sm:$0xff]  ;;  %s541_s28 = smov [#allocation2]   ;;  %s352_s30 = sshll.u32 %s678_s10, 4  ;;  %s353_s30 = int_to_ptr.hbm [resolvable:$true] %s352_s30 }
   0x7   :  { %v440_v17 = vld [vmem:[%s672_s4] ss:$0 sm:$0xff]  ;;  %s350_s1 = sshll.u32 %s541_s28, 4  ;;  %s351_s1 = int_to_ptr.vmem [resolvable:$true] %s350_s1 }
   0x8   :  { %112 = vmatpush.bf16.msra.mxu1 %v430_v3  ;;  %v442_v24 = vld [vmem:[%s676_s8] ss:$0 sm:$0xff] }
   0x9   :  { %152 = vmatpush.bf16.msra.mxu2 %v432_v14  ;;  %v441_v1 = vld [vmem:[%s674_s6] ss:$0 sm:$0xff]  ;;  %s539_s6 = smov [#allocation4]  }
   0xa   :  { %186 = vmatpush.bf16.msra.mxu3 %v434_v15  ;;  %s361_s8 = sshll.u32 %s539_s6, 4  ;;  %s362_s8 = int_to_ptr.vmem [resolvable:$true] %s361_s8 }
  0x82   :  { %v73_v4 = vpop.f32.mrf.mxu0 }
  0x83   :  { %v74_v6 = vadd.f32 %v439_v5, %v73_v4 }
  0x85   :  { %v78_v9 = vmax.f32 %v74_v6, 0.0 }
  0x8a   :  { %v75_v7 = vpop.f32.mrf.mxu0 }
  0x8b   :  { %v76_v8 = vadd.f32 %v439_v5, %v75_v7 }
  0x8d   :  { %v79_v10 = vmax.f32 %v76_v8, 0.0 }
  0x8f   :  { %v80_v11 = vpack.c.bf16 %v79_v10, %v78_v9 }
  0x91   :  { %409 = vmatmul.msk.bf16.vlgmr.msra.gmra.mxu1 %vm101_vm1, %v80_v11 }
 0x10e   :  { %v114_v16 = vpop.f32.mrf.mxu1 }
 0x10f   :  { %v115_v18 = vadd.f32 %v440_v17, %v114_v16 }
 0x111   :  { %v119_v21 = vmax.f32 %v115_v18, 0.0 }
 0x116   :  { %v116_v19 = vpop.f32.mrf.mxu1 }
 0x117   :  { %v117_v20 = vadd.f32 %v440_v17, %v116_v19 }
 0x119   :  { %v120_v22 = vmax.f32 %v117_v20, 0.0 }
 0x11b   :  { %v121_v23 = vpack.c.bf16 %v120_v22, %v119_v21 }
 0x11d   :  { %418 = vmatmul.msk.bf16.vlgmr.msra.gmra.mxu2 %vm101_vm1, %v121_v23  ;;  %427 = vmatmul.msk.bf16.vlgmr.msra.gmra.mxu3 %vm101_vm1, %v121_v23 }
 0x1a0   :  { %v188_v25 = vpop.f32.mrf.mxu3  ;;  %v154_v56 = vpop.f32.mrf.mxu2 }
 0x1a1   :  { %v189_v26 = vadd.f32 %v442_v24, %v188_v25  ;;  %v155_v5 = vadd.f32 %v441_v1, %v154_v56 }
 0x1a3   :  { %v199_v27 = vand.u32 2147483647, %v189_v26  ;;  %v193_v46 = vmax.f32 %v189_v26, 0.0  ;;  %vm195_vm3 = vcmp.ne.f32.partialorder %v189_v26, %v189_v26 }
 0x1a5   :  { %v201_v28 = vsub.f32 0.0, %v199_v27 }
 0x1a7   :  { %v203_v29 = vmul.f32 1.442695, %v201_v28 }
 0x1a8   :  { %v190_v30 = vpop.f32.mrf.mxu3  ;;  %v156_v3 = vpop.f32.mrf.mxu2 }
 0x1a9   :  { %443 = vpow2.f32 %v203_v29  ;;  %v191_v31 = vadd.f32 %v442_v24, %v190_v30  ;;  %v157_v8 = vadd.f32 %v441_v1, %v156_v3 }
 0x1ab   :  { %v200_v32 = vand.u32 2147483647, %v191_v31  ;;  %v194_v57 = vmax.f32 %v191_v31, 0.0  ;;  %vm196_vm6 = vcmp.ne.f32.partialorder %v191_v31, %v191_v31 }
 0x1ad   :  { %v202_v33 = vsub.f32 0.0, %v200_v32 }
 0x1af   :  { %v444_v34 = vpop.eup %443  ;;  %v205_v35 = vmul.f32 1.442695, %v202_v33 }
 0x1b0   :  { %v207_v36 = vadd.f32 1.0, %v444_v34  ;;  %v210_v37 = vmul.f32 -0.5, %v444_v34  ;;  %v213_v39 = vand.u32 2147483647, %v444_v34 }
 0x1b1   :  { %445 = vpow2.f32 %v205_v35 }
 0x1b2   :  { %447 = vlog2.f32 %v207_v36  ;;  %v211_v38 = vadd.f32 1.0, %v210_v37  ;;  %vm214_vm2 = vcmp.lt.f32.partialorder %v213_v39, 0.0004427343 }
 0x1b4   :  { %v212_v44 = vmul.f32 %v444_v34, %v211_v38 }
 0x1b7   :  { %v446_v40 = vpop.eup %445 }
 0x1b8   :  { %v448_v41 = vpop.eup %447  ;;  %v216_v42 = vadd.f32 1.0, %v446_v40  ;;  %v219_v45 = vmul.f32 -0.5, %v446_v40  ;;  %v222_v51 = vand.u32 2147483647, %v446_v40 }
 0x1b9   :  { %v209_v43 = vmul.f32 0.6931472, %v448_v41 }
 0x1ba   :  { %449 = vlog2.f32 %v216_v42  ;;  %v220_v49 = vadd.f32 1.0, %v219_v45  ;;  %vm223_vm4 = vcmp.lt.f32.partialorder %v222_v51, 0.0004427343 }
 0x1bb   :  { %v215_v47 = vsel %vm214_vm2, %v212_v44, %v209_v43 }
 0x1bc   :  { %v225_v48 = vadd.f32 %v215_v47, %v193_v46  ;;  %v221_v55 = vmul.f32 %v446_v40, %v220_v49 }
 0x1be   :  { %v227_v50 = vsel %vm195_vm3, %v189_v26, %v225_v48 }
 0x1bf   :  { %v229_v52 = vmax.f32 %v227_v50, 1e-07 }
 0x1c0   :  { %v450_v53 = vpop.eup %449 }
 0x1c1   :  { %451 = vrcp.f32 %v229_v52  ;;  %v218_v54 = vmul.f32 0.6931472, %v450_v53 }
 0x1c3   :  { %v224_v58 = vsel %vm223_vm4, %v221_v55, %v218_v54 }
 0x1c4   :  { %v226_v59 = vadd.f32 %v224_v58, %v194_v57 }
 0x1c6   :  { %v228_v60 = vsel %vm196_vm6, %v191_v31, %v226_v59 }
 0x1c7   :  { %v452_v61 = vpop.eup %451  ;;  %v230_v62 = vmax.f32 %v228_v60, 1e-07 }
 0x1c8   :  { %v234_v63 = vsel %vm233_vm5, %v452_v61, 0.0  ;;  %v276_v9 = vmul.f32 %v452_v61, %v155_v5 }
 0x1c9   :  { %v235_v0 = vrot.slane %v234_v63, 4  ;;  %453 = vrcp.f32 %v230_v62 }
 0x1ca   :  { %v278_v16 = vsel %vm233_vm5, %v276_v9, 0.0  ;;  %v318_v9 = vld [vmem:[%s677_s9] sm:$0x3] }
 0x1cb   :  { %v236_v2 = vadd.f32 %v235_v0, %v234_v63  ;;  %v279_v20 = vrot.slane %v278_v16, 4 }
 0x1cd   :  { %v237_v4 = vrot.slane %v236_v2, 2  ;;  %v280_v25 = vadd.f32 %v279_v20, %v278_v16 }
 0x1cf   :  { %v454_v6 = vpop.eup %453  ;;  %v238_v7 = vadd.f32 %v237_v4, %v236_v2  ;;  %v281_v30 = vrot.slane %v280_v25, 2 }
 0x1d0   :  { %v241_v10 = vsel %vm233_vm5, %v454_v6, 0.0  ;;  %v277_v13 = vmul.f32 %v454_v6, %v157_v8 }
 0x1d1   :  { %v239_v11 = vrot.slane %v238_v7, 1  ;;  %v242_v12 = vrot.slane %v241_v10, 4  ;;  %v282_v37 = vadd.f32 %v281_v30, %v280_v25 }
 0x1d2   :  { %v285_v18 = vsel %vm233_vm5, %v277_v13, 0.0 }
 0x1d3   :  { %v240_v14 = vadd.f32 %v239_v11, %v238_v7  ;;  %v243_v15 = vadd.f32 %v242_v12, %v241_v10  ;;  %v286_v21 = vrot.slane %v285_v18, 4  ;;  %v283_v44 = vrot.slane %v282_v37, 1 }
 0x1d4   :  { %v320_v11 = vrot.slane %v318_v9, 1 }
 0x1d5   :  { %455 = vrcp.f32 %v240_v14  ;;  %v244_v17 = vrot.slane %v243_v15, 2  ;;  %v287_v27 = vadd.f32 %v286_v21, %v285_v18  ;;  %v259_v29 = vand.u32 2147483648, %v240_v14 }
 0x1d6   :  { %v257_v32 = vand.u32 2147483647, %v240_v14  ;;  %vm253_vm8 = vweird.f32 %v240_v14  ;;  %v284_v52 = vadd.f32 %v283_v44, %v282_v37 }
 0x1d7   :  { %v245_v19 = vadd.f32 %v244_v17, %v243_v15  ;;  %v288_v33 = vrot.slane %v287_v27, 2  ;;  %v260_v36 = vor.u32 1.1754944e-38, %v259_v29 }
 0x1d8   :  { %vm258_vm10 = vcmp.eq.f32.partialorder %v257_v32, 8.507059e+37 }
 0x1d9   :  { %v246_v22 = vrot.slane %v245_v19, 1  ;;  %v289_v40 = vadd.f32 %v288_v33, %v287_v27 }
 0x1db   :  { %v456_v23 = vpop.eup %455  ;;  %v247_v24 = vadd.f32 %v246_v22, %v245_v19  ;;  %v290_v47 = vrot.slane %v289_v40, 1 }
 0x1dc   :  { %v249_v26 = vmul.f32 %v456_v23, %v240_v14  ;;  %vm254_vm7 = vweird.f32 %v456_v23 }
 0x1dd   :  { %457 = vrcp.f32 %v247_v24  ;;  %vm255_vm9 = vmor %vm253_vm8, %vm254_vm7  ;;  %v273_v43 = vand.u32 2147483648, %v247_v24  ;;  %v271_v46 = vand.u32 2147483647, %v247_v24  ;;  %vm267_vm12 = vweird.f32 %v247_v24 }
 0x1de   :  { %v250_v28 = vsub.f32 1.0, %v249_v26  ;;  %v291_v53 = vadd.f32 %v290_v47, %v289_v40 }
 0x1df   :  { %v274_v49 = vor.u32 1.1754944e-38, %v273_v43  ;;  %vm272_vm15 = vcmp.eq.f32.partialorder %v271_v46, 8.507059e+37 }
 0x1e0   :  { %v251_v31 = vmul.f32 %v456_v23, %v250_v28 }
 0x1e2   :  { %v252_v34 = vadd.f32 %v456_v23, %v251_v31 }
 0x1e3   :  { %v458_v35 = vpop.eup %457 }
 0x1e4   :  { %v263_v38 = vmul.f32 %v458_v35, %v247_v24  ;;  %v256_v39 = vsel %vm255_vm9, %v456_v23, %v252_v34  ;;  %vm268_vm11 = vweird.f32 %v458_v35 }
 0x1e5   :  { %v261_v41 = vsel %vm258_vm10, %v260_v36, %v256_v39  ;;  %vm269_vm13 = vmor %vm267_vm12, %vm268_vm11 }
 0x1e6   :  { %v264_v42 = vsub.f32 1.0, %v263_v38  ;;  %459 = vrsqrt.f32 %v261_v41  ;;  %v292_v56 = vmul.f32 %v284_v52, %v261_v41  ;;  %vm301_vm1 = vcmp.eq.f32.partialorder %v261_v41, inf }
 0x1e7   :  { %v304_v8 = vand.u32 2147483648, %v261_v41  ;;  %vm303_vm2 = vcmp.eq.f32.partialorder %v261_v41, 0.0 }
 0x1e8   :  { %v265_v45 = vmul.f32 %v458_v35, %v264_v42 }
 0x1ea   :  { %v266_v48 = vadd.f32 %v458_v35, %v265_v45 }
 0x1ec   :  { %v460_v50 = vpop.eup %459  ;;  %v270_v51 = vsel %vm269_vm13, %v458_v35, %v266_v48 }
 0x1ed   :  { %v275_v54 = vsel %vm272_vm15, %v274_v49, %v270_v51  ;;  %v295_v55 = vmul.f32 %v460_v50, %v261_v41 }
 0x1ee   :  { %v293_v57 = vmul.f32 %v291_v53, %v275_v54  ;;  %461 = vrsqrt.f32 %v275_v54  ;;  %v342_v59 = vsel %vm330_vm14, %v275_v54, %v261_v41  ;;  %vm313_vm3 = vcmp.eq.f32.partialorder %v275_v54, inf }
 0x1ef   :  { %v296_v58 = vmul.f32 %v460_v50, %v295_v55  ;;  %344 = vst.msk [vmem:[#allocation6] sm:$0x3] %vm333_vm0, %v342_v59  ;;  %v316_v13 = vand.u32 2147483648, %v275_v54  ;;  %vm315_vm4 = vcmp.eq.f32.partialorder %v275_v54, 0.0 }
 0x1f0   :  { %v337_v60 = vsel %vm330_vm14, %v293_v57, %v292_v56 }
 0x1f1   :  { %339 = vst.msk [vmem:[#allocation4] sm:$0x3] %vm333_vm0, %v337_v60  ;;  %v297_v61 = vmul.f32 0.5, %v296_v58 }
 0x1f2   :  { %366 = dma.vmem_to_hbm [thread:$0]  %s362_s8, 32, %s364_s22, [#allocation5]  }
 0x1f3   :  { %v298_v62 = vsub.f32 1.5, %v297_v61  ;;  %377 = dma.vmem_to_hbm [thread:$0]  %s373_s24, 32, %s375_s27, [#allocation5]  }
 0x1f4   :  { %v462_v63 = vpop.eup %461 }
 0x1f5   :  { %v299_v0 = vmul.f32 %v460_v50, %v298_v62  ;;  %v307_v1 = vmul.f32 %v462_v63, %v275_v54 }
 0x1f7   :  { %v308_v2 = vmul.f32 %v462_v63, %v307_v1  ;;  %v300_v3 = vmul.f32 %v299_v0, %v261_v41 }
 0x1f9   :  { %v309_v4 = vmul.f32 0.5, %v308_v2  ;;  %v302_v6 = vsel %vm301_vm1, %v261_v41, %v300_v3 }
 0x1fa   :  { %v305_v12 = vsel %vm303_vm2, %v304_v8, %v302_v6 }
 0x1fb   :  { %v310_v5 = vsub.f32 1.5, %v309_v4  ;;  %v323_v16 = vmul.f32 %v318_v9, %v305_v12 }
 0x1fd   :  { %v311_v7 = vmul.f32 %v462_v63, %v310_v5  ;;  %v325_v19 = vadd.f32 %v323_v16, %v292_v56 }
 0x1ff   :  { %v312_v10 = vmul.f32 %v311_v7, %v275_v54 }
 0x201   :  { %v314_v14 = vsel %vm313_vm3, %v275_v54, %v312_v10 }
 0x202   :  { %v317_v15 = vsel %vm315_vm4, %v316_v13, %v314_v14 }
 0x203   :  { %v324_v17 = vmul.f32 %v320_v11, %v317_v15 }
 0x205   :  { %v326_v18 = vadd.f32 %v324_v17, %v293_v57 }
 0x207   :  { %v329_v20 = vrot.slane %v326_v18, 7 }
 0x209   :  { %v331_v21 = vsel %vm330_vm14, %v329_v20, %v325_v19 }
 0x20a   :  { %334 = vst.msk [vmem:[#allocation2] sm:$0x3] %vm333_vm0, %v331_v21 }
 0x20b   :  { %355 = dma.vmem_to_hbm [thread:$0]  %s351_s1, 32, %s353_s30, [#allocation3]  }
 0x20c   :  { %535 = dma.done.wait [#allocation3], 32  }
 0x20d   :  { %536 = vsyncadd [#allocation3], 4294967264 }
 0x20e   :  { %537 = dma.done.wait [#allocation5], 64  }
 0x20f   :  { %538 = vsyncadd [#allocation5], 4294967232 }
 0x210   :  { %390 = vsyncpa [#allocation3], 1 }
 0x211   :  { %391 = vsyncpa [#allocation5], 1 }

// kernel: tpu_custom_call.1
= control target key start
LH: loop header
LB: loop body
LE: loop exit
PB: predicated region body
PF: predicated region fallthrough
CT: control target
= control target key end

     0   :  { %18 = vsyncpa [#allocation3], 0  ;;  %vm60_vm0 = vcmask 130048   ;;  %s668_s0 = inlined_call_operand.vmem [shape: bf16[16,16], index: 0, kind: input, shape index: {}]   ;;  %s669_s1 = inlined_call_operand.vmem [shape: bf16[16,32], index: 1, kind: input, shape index: {}]   ;;  %s670_s2 = inlined_call_operand.vmem [shape: f32[1,32], index: 2, kind: input, shape index: {}]   ;;  %s671_s3 = inlined_call_operand.vmem [shape: bf16[32,32], index: 3, kind: input, shape index: {}]   ;;  %s672_s4 = inlined_call_operand.vmem [shape: f32[1,32], index: 4, kind: input, shape index: {}]   ;;  %s673_s5 = inlined_call_operand.vmem [shape: bf16[32,8], index: 5, kind: input, shape index: {}]   ;;  %s674_s6 = inlined_call_operand.vmem [shape: f32[1,8], index: 6, kind: input, shape index: {}]   ;;  %s675_s7 = inlined_call_operand.vmem [shape: bf16[32,8], index: 7, kind: input, shape index: {}]   ;;  %s676_s8 = inlined_call_operand.vmem [shape: f32[1,8], index: 8, kind: input, shape index: {}]   ;;  %s677_s9 = inlined_call_operand.vmem [shape: f32[2,8], index: 9, kind: input, shape index: {}]   ;;  %s678_s10 = inlined_call_operand.hbm [shape: f32[2,8], index: 10, kind: output, shape index: {0}]   ;;  %s679_s11 = inlined_call_operand.hbm [shape: f32[2,8], index: 11, kind: output, shape index: {1}]   ;;  %s680_s12 = inlined_call_operand.hbm [shape: f32[2,8], index: 12, kind: output, shape index: {2}]  }
   0x1   :  { %v429_v0 = vld [vmem:[%s669_s1] sm:$0xff] }
   0x2   :  { %v428_v1 = vld [vmem:[%s668_s0] sm:$0xff]  ;;  %71 = vmatpush.bf16.msra.mxu0 %v429_v0 }
   0x3   :  { %19 = vsyncpa [#allocation5], 0  ;;  %v431_v2 = vld [vmem:[%s671_s3 + $0x8] sm:$0xff]  ;;  %v430_v3 = vld [vmem:[%s671_s3] sm:$0xff]  ;;  %vm101_vm1 = vcmask 261120   ;;  %vm233_vm5 = vcmask 64512  }
   0x4   :  { %111 = vmatpush.bf16.msra.mxu1 %v431_v2  ;;  %v439_v5 = vld [vmem:[%s670_s2] ss:$0 sm:$0xff]  ;;  %v433_v12 = vld [vmem:[%s673_s5 + $0x8] sm:$0xff]  ;;  %vm330_vm14 = vcmask 1041409   ;;  %s363_s22 = sshll.u32 %s679_s11, 4  ;;  %s540_s23 = smov [#allocation6]   ;;  %s364_s22 = int_to_ptr.hbm [resolvable:$true] %s363_s22 }
   0x5   :  { %400 = vmatmul.msk.bf16.vlgmr.msra.gmra.mxu0 %vm60_vm0, %v428_v1  ;;  %v435_v13 = vld [vmem:[%s675_s7 + $0x8] sm:$0xff]  ;;  %151 = vmatpush.bf16.msra.mxu2 %v433_v12  ;;  %v432_v14 = vld [vmem:[%s673_s5] sm:$0xff]  ;;  %vm333_vm0 = vcmask 58368   ;;  %s372_s24 = sshll.u32 %s540_s23, 4  ;;  %s374_s27 = sshll.u32 %s680_s12, 4  ;;  %s373_s24 = int_to_ptr.vmem [resolvable:$true] %s372_s24  ;;  %s375_s27 = int_to_ptr.hbm [resolvable:$true] %s374_s27 }
   0x6   :  { %185 = vmatpush.bf16.msra.mxu3 %v435_v13  ;;  %v434_v15 = vld [vmem:[%s675_s7] sm:$0xff]  ;;  %s541_s28 = smov [#allocation2]   ;;  %s352_s30 = sshll.u32 %s678_s10, 4  ;;  %s353_s30 = int_to_ptr.hbm [resolvable:$true] %s352_s30 }
   0x7   :  { %v440_v17 = vld [vmem:[%s672_s4] ss:$0 sm:$0xff]  ;;  %s350_s1 = sshll.u32 %s541_s28, 4  ;;  %s351_s1 = int_to_ptr.vmem [resolvable:$true] %s350_s1 }
   0x8   :  { %112 = vmatpush.bf16.msra.mxu1 %v430_v3  ;;  %v442_v24 = vld [vmem:[%s676_s8] ss:$0 sm:$0xff] }
   0x9   :  { %152 = vmatpush.bf16.msra.mxu2 %v432_v14  ;;  %v441_v1 = vld [vmem:[%s674_s6] ss:$0 sm:$0xff]  ;;  %s539_s6 = smov [#allocation4]  }
   0xa   :  { %186 = vmatpush.bf16.msra.mxu3 %v434_v15  ;;  %s361_s8 = sshll.u32 %s539_s6, 4  ;;  %s362_s8 = int_to_ptr.vmem [resolvable:$true] %s361_s8 }
  0x82   :  { %v73_v4 = vpop.f32.mrf.mxu0 }
  0x83   :  { %v74_v6 = vadd.f32 %v439_v5, %v73_v4 }
  0x85   :  { %v78_v9 = vmax.f32 %v74_v6, 0.0 }
  0x8a   :  { %v75_v7 = vpop.f32.mrf.mxu0 }
  0x8b   :  { %v76_v8 = vadd.f32 %v439_v5, %v75_v7 }
  0x8d   :  { %v79_v10 = vmax.f32 %v76_v8, 0.0 }
  0x8f   :  { %v80_v11 = vpack.c.bf16 %v79_v10, %v78_v9 }
  0x91   :  { %409 = vmatmul.msk.bf16.vlgmr.msra.gmra.mxu1 %vm101_vm1, %v80_v11 }
 0x10e   :  { %v114_v16 = vpop.f32.mrf.mxu1 }
 0x10f   :  { %v115_v18 = vadd.f32 %v440_v17, %v114_v16 }
 0x111   :  { %v119_v21 = vmax.f32 %v115_v18, 0.0 }
 0x116   :  { %v116_v19 = vpop.f32.mrf.mxu1 }
 0x117   :  { %v117_v20 = vadd.f32 %v440_v17, %v116_v19 }
 0x119   :  { %v120_v22 = vmax.f32 %v117_v20, 0.0 }
 0x11b   :  { %v121_v23 = vpack.c.bf16 %v120_v22, %v119_v21 }
 0x11d   :  { %418 = vmatmul.msk.bf16.vlgmr.msra.gmra.mxu2 %vm101_vm1, %v121_v23  ;;  %427 = vmatmul.msk.bf16.vlgmr.msra.gmra.mxu3 %vm101_vm1, %v121_v23 }
 0x1a0   :  { %v188_v25 = vpop.f32.mrf.mxu3  ;;  %v154_v56 = vpop.f32.mrf.mxu2 }
 0x1a1   :  { %v189_v26 = vadd.f32 %v442_v24, %v188_v25  ;;  %v155_v5 = vadd.f32 %v441_v1, %v154_v56 }
 0x1a3   :  { %v199_v27 = vand.u32 2147483647, %v189_v26  ;;  %v193_v46 = vmax.f32 %v189_v26, 0.0  ;;  %vm195_vm3 = vcmp.ne.f32.partialorder %v189_v26, %v189_v26 }
 0x1a5   :  { %v201_v28 = vsub.f32 0.0, %v199_v27 }
 0x1a7   :  { %v203_v29 = vmul.f32 1.442695, %v201_v28 }
 0x1a8   :  { %v190_v30 = vpop.f32.mrf.mxu3  ;;  %v156_v3 = vpop.f32.mrf.mxu2 }
 0x1a9   :  { %443 = vpow2.f32 %v203_v29  ;;  %v191_v31 = vadd.f32 %v442_v24, %v190_v30  ;;  %v157_v8 = vadd.f32 %v441_v1, %v156_v3 }
 0x1ab   :  { %v200_v32 = vand.u32 2147483647, %v191_v31  ;;  %v194_v57 = vmax.f32 %v191_v31, 0.0  ;;  %vm196_vm6 = vcmp.ne.f32.partialorder %v191_v31, %v191_v31 }
 0x1ad   :  { %v202_v33 = vsub.f32 0.0, %v200_v32 }
 0x1af   :  { %v444_v34 = vpop.eup %443  ;;  %v205_v35 = vmul.f32 1.442695, %v202_v33 }
 0x1b0   :  { %v207_v36 = vadd.f32 1.0, %v444_v34  ;;  %v210_v37 = vmul.f32 -0.5, %v444_v34  ;;  %v213_v39 = vand.u32 2147483647, %v444_v34 }
 0x1b1   :  { %445 = vpow2.f32 %v205_v35 }
 0x1b2   :  { %447 = vlog2.f32 %v207_v36  ;;  %v211_v38 = vadd.f32 1.0, %v210_v37  ;;  %vm214_vm2 = vcmp.lt.f32.partialorder %v213_v39, 0.0004427343 }
 0x1b4   :  { %v212_v44 = vmul.f32 %v444_v34, %v211_v38 }
 0x1b7   :  { %v446_v40 = vpop.eup %445 }
 0x1b8   :  { %v448_v41 = vpop.eup %447  ;;  %v216_v42 = vadd.f32 1.0, %v446_v40  ;;  %v219_v45 = vmul.f32 -0.5, %v446_v40  ;;  %v222_v51 = vand.u32 2147483647, %v446_v40 }
 0x1b9   :  { %v209_v43 = vmul.f32 0.6931472, %v448_v41 }
 0x1ba   :  { %449 = vlog2.f32 %v216_v42  ;;  %v220_v49 = vadd.f32 1.0, %v219_v45  ;;  %vm223_vm4 = vcmp.lt.f32.partialorder %v222_v51, 0.0004427343 }
 0x1bb   :  { %v215_v47 = vsel %vm214_vm2, %v212_v44, %v209_v43 }
 0x1bc   :  { %v225_v48 = vadd.f32 %v215_v47, %v193_v46  ;;  %v221_v55 = vmul.f32 %v446_v40, %v220_v49 }
 0x1be   :  { %v227_v50 = vsel %vm195_vm3, %v189_v26, %v225_v48 }
 0x1bf   :  { %v229_v52 = vmax.f32 %v227_v50, 1e-07 }
 0x1c0   :  { %v450_v53 = vpop.eup %449 }
 0x1c1   :  { %451 = vrcp.f32 %v229_v52  ;;  %v218_v54 = vmul.f32 0.6931472, %v450_v53 }
 0x1c3   :  { %v224_v58 = vsel %vm223_vm4, %v221_v55, %v218_v54 }
 0x1c4   :  { %v226_v59 = vadd.f32 %v224_v58, %v194_v57 }
 0x1c6   :  { %v228_v60 = vsel %vm196_vm6, %v191_v31, %v226_v59 }
 0x1c7   :  { %v452_v61 = vpop.eup %451  ;;  %v230_v62 = vmax.f32 %v228_v60, 1e-07 }
 0x1c8   :  { %v234_v63 = vsel %vm233_vm5, %v452_v61, 0.0  ;;  %v276_v9 = vmul.f32 %v452_v61, %v155_v5 }
 0x1c9   :  { %v235_v0 = vrot.slane %v234_v63, 4  ;;  %453 = vrcp.f32 %v230_v62 }
 0x1ca   :  { %v278_v16 = vsel %vm233_vm5, %v276_v9, 0.0  ;;  %v318_v9 = vld [vmem:[%s677_s9] sm:$0x3] }
 0x1cb   :  { %v236_v2 = vadd.f32 %v235_v0, %v234_v63  ;;  %v279_v20 = vrot.slane %v278_v16, 4 }
 0x1cd   :  { %v237_v4 = vrot.slane %v236_v2, 2  ;;  %v280_v25 = vadd.f32 %v279_v20, %v278_v16 }
 0x1cf   :  { %v454_v6 = vpop.eup %453  ;;  %v238_v7 = vadd.f32 %v237_v4, %v236_v2  ;;  %v281_v30 = vrot.slane %v280_v25, 2 }
 0x1d0   :  { %v241_v10 = vsel %vm233_vm5, %v454_v6, 0.0  ;;  %v277_v13 = vmul.f32 %v454_v6, %v157_v8 }
 0x1d1   :  { %v239_v11 = vrot.slane %v238_v7, 1  ;;  %v242_v12 = vrot.slane %v241_v10, 4  ;;  %v282_v37 = vadd.f32 %v281_v30, %v280_v25 }
 0x1d2   :  { %v285_v18 = vsel %vm233_vm5, %v277_v13, 0.0 }
 0x1d3   :  { %v240_v14 = vadd.f32 %v239_v11, %v238_v7  ;;  %v243_v15 = vadd.f32 %v242_v12, %v241_v10  ;;  %v286_v21 = vrot.slane %v285_v18, 4  ;;  %v283_v44 = vrot.slane %v282_v37, 1 }
 0x1d4   :  { %v320_v11 = vrot.slane %v318_v9, 1 }
 0x1d5   :  { %455 = vrcp.f32 %v240_v14  ;;  %v244_v17 = vrot.slane %v243_v15, 2  ;;  %v287_v27 = vadd.f32 %v286_v21, %v285_v18  ;;  %v259_v29 = vand.u32 2147483648, %v240_v14 }
 0x1d6   :  { %v257_v32 = vand.u32 2147483647, %v240_v14  ;;  %vm253_vm8 = vweird.f32 %v240_v14  ;;  %v284_v52 = vadd.f32 %v283_v44, %v282_v37 }
 0x1d7   :  { %v245_v19 = vadd.f32 %v244_v17, %v243_v15  ;;  %v288_v33 = vrot.slane %v287_v27, 2  ;;  %v260_v36 = vor.u32 1.1754944e-38, %v259_v29 }
 0x1d8   :  { %vm258_vm10 = vcmp.eq.f32.partialorder %v257_v32, 8.507059e+37 }
 0x1d9   :  { %v246_v22 = vrot.slane %v245_v19, 1  ;;  %v289_v40 = vadd.f32 %v288_v33, %v287_v27 }
 0x1db   :  { %v456_v23 = vpop.eup %455  ;;  %v247_v24 = vadd.f32 %v246_v22, %v245_v19  ;;  %v290_v47 = vrot.slane %v289_v40, 1 }
 0x1dc   :  { %v249_v26 = vmul.f32 %v456_v23, %v240_v14  ;;  %vm254_vm7 = vweird.f32 %v456_v23 }
 0x1dd   :  { %457 = vrcp.f32 %v247_v24  ;;  %vm255_vm9 = vmor %vm253_vm8, %vm254_vm7  ;;  %v273_v43 = vand.u32 2147483648, %v247_v24  ;;  %v271_v46 = vand.u32 2147483647, %v247_v24  ;;  %vm267_vm12 = vweird.f32 %v247_v24 }
 0x1de   :  { %v250_v28 = vsub.f32 1.0, %v249_v26  ;;  %v291_v53 = vadd.f32 %v290_v47, %v289_v40 }
 0x1df   :  { %v274_v49 = vor.u32 1.1754944e-38, %v273_v43  ;;  %vm272_vm15 = vcmp.eq.f32.partialorder %v271_v46, 8.507059e+37 }
 0x1e0   :  { %v251_v31 = vmul.f32 %v456_v23, %v250_v28 }
 0x1e2   :  { %v252_v34 = vadd.f32 %v456_v23, %v251_v31 }
 0x1e3   :  { %v458_v35 = vpop.eup %457 }
 0x1e4   :  { %v263_v38 = vmul.f32 %v458_v35, %v247_v24  ;;  %v256_v39 = vsel %vm255_vm9, %v456_v23, %v252_v34  ;;  %vm268_vm11 = vweird.f32 %v458_v35 }
 0x1e5   :  { %v261_v41 = vsel %vm258_vm10, %v260_v36, %v256_v39  ;;  %vm269_vm13 = vmor %vm267_vm12, %vm268_vm11 }
 0x1e6   :  { %v264_v42 = vsub.f32 1.0, %v263_v38  ;;  %459 = vrsqrt.f32 %v261_v41  ;;  %v292_v56 = vmul.f32 %v284_v52, %v261_v41  ;;  %vm301_vm1 = vcmp.eq.f32.partialorder %v261_v41, inf }
 0x1e7   :  { %v304_v8 = vand.u32 2147483648, %v261_v41  ;;  %vm303_vm2 = vcmp.eq.f32.partialorder %v261_v41, 0.0 }
 0x1e8   :  { %v265_v45 = vmul.f32 %v458_v35, %v264_v42 }
 0x1ea   :  { %v266_v48 = vadd.f32 %v458_v35, %v265_v45 }
 0x1ec   :  { %v460_v50 = vpop.eup %459  ;;  %v270_v51 = vsel %vm269_vm13, %v458_v35, %v266_v48 }
 0x1ed   :  { %v275_v54 = vsel %vm272_vm15, %v274_v49, %v270_v51  ;;  %v295_v55 = vmul.f32 %v460_v50, %v261_v41 }
 0x1ee   :  { %v293_v57 = vmul.f32 %v291_v53, %v275_v54  ;;  %461 = vrsqrt.f32 %v275_v54  ;;  %v342_v59 = vsel %vm330_vm14, %v275_v54, %v261_v41  ;;  %vm313_vm3 = vcmp.eq.f32.partialorder %v275_v54, inf }
 0x1ef   :  { %v296_v58 = vmul.f32 %v460_v50, %v295_v55  ;;  %344 = vst.msk [vmem:[#allocation6] sm:$0x3] %vm333_vm0, %v342_v59  ;;  %v316_v13 = vand.u32 2147483648, %v275_v54  ;;  %vm315_vm4 = vcmp.eq.f32.partialorder %v275_v54, 0.0 }
 0x1f0   :  { %v337_v60 = vsel %vm330_vm14, %v293_v57, %v292_v56 }
 0x1f1   :  { %339 = vst.msk [vmem:[#allocation4] sm:$0x3] %vm333_vm0, %v337_v60  ;;  %v297_v61 = vmul.f32 0.5, %v296_v58 }
 0x1f2   :  { %366 = dma.vmem_to_hbm [thread:$0]  %s362_s8, 32, %s364_s22, [#allocation5]  }
 0x1f3   :  { %v298_v62 = vsub.f32 1.5, %v297_v61  ;;  %377 = dma.vmem_to_hbm [thread:$0]  %s373_s24, 32, %s375_s27, [#allocation5]  }
 0x1f4   :  { %v462_v63 = vpop.eup %461 }
 0x1f5   :  { %v299_v0 = vmul.f32 %v460_v50, %v298_v62  ;;  %v307_v1 = vmul.f32 %v462_v63, %v275_v54 }
 0x1f7   :  { %v308_v2 = vmul.f32 %v462_v63, %v307_v1  ;;  %v300_v3 = vmul.f32 %v299_v0, %v261_v41 }
 0x1f9   :  { %v309_v4 = vmul.f32 0.5, %v308_v2  ;;  %v302_v6 = vsel %vm301_vm1, %v261_v41, %v300_v3 }
 0x1fa   :  { %v305_v12 = vsel %vm303_vm2, %v304_v8, %v302_v6 }
 0x1fb   :  { %v310_v5 = vsub.f32 1.5, %v309_v4  ;;  %v323_v16 = vmul.f32 %v318_v9, %v305_v12 }
 0x1fd   :  { %v311_v7 = vmul.f32 %v462_v63, %v310_v5  ;;  %v325_v19 = vadd.f32 %v323_v16, %v292_v56 }
 0x1ff   :  { %v312_v10 = vmul.f32 %v311_v7, %v275_v54 }
 0x201   :  { %v314_v14 = vsel %vm313_vm3, %v275_v54, %v312_v10 }
 0x202   :  { %v317_v15 = vsel %vm315_vm4, %v316_v13, %v314_v14 }
 0x203   :  { %v324_v17 = vmul.f32 %v320_v11, %v317_v15 }
 0x205   :  { %v326_v18 = vadd.f32 %v324_v17, %v293_v57 }
 0x207   :  { %v329_v20 = vrot.slane %v326_v18, 7 }
 0x209   :  { %v331_v21 = vsel %vm330_vm14, %v329_v20, %v325_v19 }
 0x20a   :  { %334 = vst.msk [vmem:[#allocation2] sm:$0x3] %vm333_vm0, %v331_v21 }
 0x20b   :  { %355 = dma.vmem_to_hbm [thread:$0]  %s351_s1, 32, %s353_s30, [#allocation3]  }
 0x20c   :  { %535 = dma.done.wait [#allocation3], 32  }
 0x20d   :  { %536 = vsyncadd [#allocation3], 4294967264 }
 0x20e   :  { %537 = dma.done.wait [#allocation5], 64  }
 0x20f   :  { %538 = vsyncadd [#allocation5], 4294967232 }
 0x210   :  { %390 = vsyncpa [#allocation3], 1 }
 0x211   :  { %391 = vsyncpa [#allocation5], 1 }

</bundles_post_ra>
